<compile_context>
chip_gen: v6e
topology: v6e:2x2x1
jax: 0.10.0
libtpu: 0.0.40
codegen_flags: <defaults>
</compile_context>

<pallas_src>
import functools

import jax
import jax.numpy as jnp
from jax.experimental import pallas as pl
from jax.experimental.pallas import tpu as pltpu

IN_FEATURES = 768
OUT_FEATURES = 512


def linear_kernel(x_ref, w_ref, b_ref, o_ref):
    """One (tm, N) output tile: single MXU dot (f32 accum) + f32 bias add."""
    o_ref[...] = (
        jnp.dot(x_ref[...], w_ref[...], preferred_element_type=jnp.float32)
        + b_ref[...]
    ).astype(o_ref.dtype)


@functools.partial(jax.jit, static_argnames=("tm", "out_dtype"))
def _linear_projection_impl(x, w_t, b2, *, tm, out_dtype):
    M, K = x.shape
    Kw, N = w_t.shape
    assert K == Kw

    grid = (pl.cdiv(M, tm),)

    return pl.pallas_call(
        linear_kernel,
        out_shape=jax.ShapeDtypeStruct((M, N), out_dtype),
        grid=grid,
        in_specs=[
            pl.BlockSpec((tm, K), lambda i: (i, 0)),   # x row tile (bf16)
            pl.BlockSpec((K, N), lambda i: (0, 0)),    # full weight, resident (bf16)
            pl.BlockSpec((1, N), lambda i: (0, 0)),    # bias, resident (f32)
        ],
        out_specs=pl.BlockSpec((tm, N), lambda i: (i, 0)),
        compiler_params=pltpu.CompilerParams(
            dimension_semantics=("parallel",)
        ),
    )(x, w_t, b2)


def _choose_tm(M):
    """Row-tile size: single block only for tiny (weight-bound) M; otherwise
    at least 2 blocks (pipelining + v7x dual-TensorCore), capped at 1024 rows."""
    if M < 128:
        return M
    nblocks = max(2, -(-M // 1024))     # ceil(M / 1024), but never fewer than 2
    tm = -(-M // nblocks)               # ceil(M / nblocks)
    tm = -(-tm // 16) * 16              # round up to bf16 sublane pack (16 rows)
    return min(tm, 1024)


def linear_projection(x, w_t, b):
    """y = x @ w_t + b  (w_t is the transposed PyTorch weight, shape (768, 512))."""
    M, _ = x.shape
    N = w_t.shape[1]
    out_dtype = x.dtype

    # bf16 inputs (MXU-native, half the HBM bytes); f32 bias + f32 accumulation.
    x_bf = x.astype(jnp.bfloat16)
    w_bf = w_t.astype(jnp.bfloat16)
    b2 = b.reshape(1, N).astype(jnp.float32)

    tm = _choose_tm(M)
    return _linear_projection_impl(x_bf, w_bf, b2, tm=tm, out_dtype=out_dtype)


if __name__ == "__main__":
    key = jax.random.PRNGKey(0)
    k_x, k_x2, k_w, k_b = jax.random.split(key, 4)

    # Deterministic parameter init (mimics nn.Linear's uniform(-1/sqrt(K), 1/sqrt(K))).
    bound = 1.0 / jnp.sqrt(jnp.float32(IN_FEATURES))
    # PyTorch weight is (512, 768); we store its transpose (768, 512) for the kernel.
    w = jax.random.uniform(
        k_w, (OUT_FEATURES, IN_FEATURES), jnp.float32, -bound, bound
    )
    b = jax.random.uniform(k_b, (OUT_FEATURES,), jnp.float32, -bound, bound)
    w_t = w.T

    def reference(x):
        # Same bf16 input rounding as the kernel, f32 accumulation + f32 bias.
        xf = x.astype(jnp.bfloat16).astype(jnp.float32)
        wf = w_t.astype(jnp.bfloat16).astype(jnp.float32)
        return xf @ wf + b

    # Small serving-style batch: (8, 768) -> (8, 512). Single-block, weight-bound path.
    x_small = jax.random.normal(k_x, (8, IN_FEATURES), jnp.float32)
    y_small = linear_projection(x_small, w_t, b)
    jax.block_until_ready(y_small)
    assert y_small.shape == (8, OUT_FEATURES)
    assert y_small.dtype == jnp.float32
    assert jnp.allclose(y_small, reference(x_small), atol=2e-3, rtol=2e-3)

    # Mid-size batch: (256, 768) -> (256, 512). Exercises the >= 2-block pipelined path.
    x_mid = jax.random.normal(k_x2, (256, IN_FEATURES), jnp.float32)
    y_mid = linear_projection(x_mid, w_t, b)
    jax.block_until_ready(y_mid)
    assert y_mid.shape == (256, OUT_FEATURES)
    assert jnp.allclose(y_mid, reference(x_mid), atol=2e-3, rtol=2e-3)

    print("KERNEL_OK")
</pallas_src>

<mosaic_0001>
module attributes {stable_mosaic.version = 11 : i64} {
  func.func @linear_kernel(%arg0: i32, %arg1: memref<8x768xbf16, #tpu.memory_space<vmem>>, %arg2: memref<768x512xbf16, #tpu.memory_space<vmem>>, %arg3: memref<1x512xf32, #tpu.memory_space<vmem>>, %arg4: memref<8x512xf32, #tpu.memory_space<vmem>>) attributes {dimension_semantics = [#tpu.dimension_semantics<parallel>], iteration_bounds = array<i64: 1>, scalar_prefetch = 0 : i64, scratch_operands = 0 : i64, tpu.core_type = #tpu.core_type<tc>, window_params = [{transform_indices = @transform_0, window_bounds = array<i64: 8, 768>}, {pipeline_mode = #tpu.pipeline_mode<synchronous>, transform_indices = @transform_1, window_bounds = array<i64: 768, 512>}, {pipeline_mode = #tpu.pipeline_mode<synchronous>, transform_indices = @transform_2, window_bounds = array<i64: 1, 512>}, {transform_indices = @transform_3, window_bounds = array<i64: 8, 512>}]} {
    %c0 = arith.constant 0 : index
    %c0_0 = arith.constant 0 : index
    %0 = vector.load %arg1[%c0, %c0_0] : memref<8x768xbf16, #tpu.memory_space<vmem>>, vector<8x768xbf16>
    %c0_1 = arith.constant 0 : index
    %c0_2 = arith.constant 0 : index
    %1 = vector.load %arg2[%c0_1, %c0_2] : memref<768x512xbf16, #tpu.memory_space<vmem>>, vector<768x512xbf16>
    %cst = arith.constant dense<0.000000e+00> : vector<8x512xf32>
    %2 = tpu.matmul %0, %1, %cst {dimension_numbers = #tpu.dot_dimension_numbers<[1], [0], [0], [1], [0, 0, 1, 1], [], []>} : vector<8x768xbf16>, vector<768x512xbf16>, vector<8x512xf32> -> vector<8x512xf32>
    %c0_3 = arith.constant 0 : index
    %c0_4 = arith.constant 0 : index
    %3 = vector.load %arg3[%c0_3, %c0_4] : memref<1x512xf32, #tpu.memory_space<vmem>>, vector<1x512xf32>
    %4 = vector.broadcast %3 : vector<1x512xf32> to vector<8x512xf32>
    %5 = arith.addf %2, %4 : vector<8x512xf32>
    %c0_5 = arith.constant 0 : index
    %c0_6 = arith.constant 0 : index
    %6 = vector.load %arg4[%c0_5, %c0_6] : memref<8x512xf32, #tpu.memory_space<vmem>>, vector<8x512xf32>
    tpu.vector_store %arg4[%c0_5, %c0_6], %5 {strides = array<i32>} : memref<8x512xf32, #tpu.memory_space<vmem>>, vector<8x512xf32>,
    return
  }
  func.func @transform_0(%arg0: i32) -> (i32, i32) {
    %c0_i32 = arith.constant 0 : i32
    %c0_i32_0 = arith.constant 0 : i32
    return %arg0, %c0_i32 : i32, i32
  }
  func.func @transform_1(%arg0: i32) -> (i32, i32) {
    %c0_i32 = arith.constant 0 : i32
    %c0_i32_0 = arith.constant 0 : i32
    %c0_i32_1 = arith.constant 0 : i32
    return %c0_i32, %c0_i32_0 : i32, i32
  }
  func.func @transform_2(%arg0: i32) -> (i32, i32) {
    %c0_i32 = arith.constant 0 : i32
    %c0_i32_0 = arith.constant 0 : i32
    %c0_i32_1 = arith.constant 0 : i32
    return %c0_i32, %c0_i32_0 : i32, i32
  }
  func.func @transform_3(%arg0: i32) -> (i32, i32) {
    %c0_i32 = arith.constant 0 : i32
    %c0_i32_0 = arith.constant 0 : i32
    return %arg0, %c0_i32 : i32, i32
  }
}

</mosaic_0001>

<bundles_post_ra>
// kernel: _linear_projection_impl.1
= control target key start
LH: loop header
LB: loop body
LE: loop exit
PB: predicated region body
PF: predicated region fallthrough
CT: control target
= control target key end

     0   :  { %8 = vsyncpa [#allocation3], 0  ;;  %s2168_s0 = inlined_call_operand.hbm [shape: bf16[8,768], index: 0, kind: input, shape index: {}]   ;;  %s2169_s1 = inlined_call_operand.hbm [shape: bf16[768,512], index: 1, kind: input, shape index: {}]   ;;  %s2170_s2 = inlined_call_operand.hbm [shape: f32[1,512], index: 2, kind: input, shape index: {}]   ;;  %s2171_s3 = inlined_call_operand.hbm [shape: f32[8,512], index: 3, kind: output, shape index: {}]  }
   0x1   :  { %9 = vsyncpa [#allocation6], 0 }
   0x2   :  { %10 = vsyncpa [#allocation4], 0  ;;  %s2100_s12 = smov [#allocation5]  }
   0x3   :  { %s26_s13 = sshll.u32 %s2100_s12, 4  ;;  %s27_s13 = int_to_ptr.vmem [resolvable:$true] %s26_s13 }
   0x4   :  { %s2022_s14 = scalar_lea.vmem %s27_s13, 24576  ;;  %p2027_p1 = scmp.lt.s32.totalorder %s27_s13, %s27_s13 }
   0x5   :  { %p2023_p0 = scmp.ne.s32.totalorder %s27_s13, %s2022_s14  ;;  %p2028_p2 = scmp.lt.s32.totalorder %s2022_s14, %s2022_s14 }
   0x7   :  { %p2029_p3 = por %p2028_p2, %p2027_p1 }
   0x9   :  { %p2030_p4 = pnand %p2029_p3, %p2023_p0 }
   0xb   :  { %2033 = shalt.err (!%p2030_p4)
}
   0xc   :  { %s2101_s15 = smov 256   ;;  %s2102_s16 = smov 16  }
   0xd   :  { %32 = dma.hbm_to_vmem [thread:$0]  %s2169_s1, 24576, %s27_s13, [#allocation6], %s2101_s15, %s2101_s15, %s2102_s16  }
   0xe   :  { %s2103_s19 = smov [#allocation2]   ;;  %s2104_s21 = smov [#allocation7]  }
   0xf   :  { %s17_s20 = sshll.u32 %s2103_s19, 4  ;;  %s39_s22 = sshll.u32 %s2104_s21, 4  ;;  %s18_s20 = int_to_ptr.vmem [resolvable:$true] %s17_s20  ;;  %s40_s22 = int_to_ptr.vmem [resolvable:$true] %s39_s22 }
  0x10   :  { %s2042_s23 = scalar_lea.vmem %s18_s20, 384  ;;  %p2047_p6 = scmp.lt.s32.totalorder %s18_s20, %s18_s20 }
  0x11   :  { %p2043_p5 = scmp.ne.s32.totalorder %s18_s20, %s2042_s23  ;;  %p2048_p7 = scmp.lt.s32.totalorder %s2042_s23, %s2042_s23 }
  0x13   :  { %p2049_p8 = por %p2048_p7, %p2047_p6 }
  0x15   :  { %p2050_p9 = pnand %p2049_p8, %p2043_p5 }
  0x17   :  { %2053 = shalt.err (!%p2050_p9)
}
  0x18   :  { %20 = dma.hbm_to_vmem [thread:$0]  %s2168_s0, 384, %s18_s20, [#allocation3]  }
  0x19   :  { %s2062_s26 = scalar_lea.vmem %s40_s22, 64  ;;  %p2067_p11 = scmp.lt.s32.totalorder %s40_s22, %s40_s22 }
  0x1a   :  { %p2063_p10 = scmp.ne.s32.totalorder %s40_s22, %s2062_s26  ;;  %p2068_p12 = scmp.lt.s32.totalorder %s2062_s26, %s2062_s26 }
  0x1c   :  { %p2069_p13 = por %p2068_p12, %p2067_p11 }
  0x1e   :  { %p2070_p0 = pnand %p2069_p13, %p2063_p10 }
  0x20   :  { %2073 = shalt.err (!%p2070_p0)
}
  0x21   :  { %42 = dma.hbm_to_vmem [thread:$0]  %s2170_s2, 64, %s40_s22, [#allocation6]  }
  0x22   :  { %2094 = dma.done.wait [#allocation3], 384  }
  0x23   :  { %2095 = vsyncadd [#allocation3], 4294966912 }
  0x24   :  { %2096 = dma.done.wait [#allocation6], 24640  }
  0x25   :  { %2097 = vsyncadd [#allocation6], 4294942656  ;;  %v1720_v0 = vld [vmem:[#allocation5 + $0xe4] ss:$16 sps:$4 sm:$0xff]   ;;  %v1724_v2 = vld [vmem:[#allocation5 + $0xe0] ss:$16 sps:$4 sm:$0xff]  }
  0x26   :  { %v1722_v1 = vld [vmem:[#allocation5 + $0x2e4] ss:$16 sps:$4 sm:$0xff]   ;;  %1250 = vmatprep.subr.bf16.mxu0 %v1720_v0  ;;  %v1725_v3 = vld [vmem:[#allocation5 + $0x2e0] ss:$16 sps:$4 sm:$0xff]   ;;  %v52_v46 = vld [vmem:[#allocation2] sm:$0xff]  ;;  %s2105_s0 = smov [#allocation8]  }
  0x27   :  { %1291 = vmatprep.subr.bf16.mxu1 %v1722_v1  ;;  %v1726_v4 = vld [vmem:[#allocation5 + $0xc4] ss:$16 sps:$4 sm:$0xff]   ;;  %1251 = vmatpush1.bf16.msra.mxu0 %v1724_v2  ;;  %v1730_v6 = vld [vmem:[#allocation5 + $0xc0] ss:$16 sps:$4 sm:$0xff]   ;;  %v2135_v47 = vcombine.high %v52_v46, %v52_v46  ;;  %s1506_s2 = sshll.u32 %s2105_s0, 4  ;;  %s1507_s2 = int_to_ptr.vmem [resolvable:$true] %s1506_s2 }
  0x28   :  { %1292 = vmatpush1.bf16.msra.mxu1 %v1725_v3  ;;  %v1728_v5 = vld [vmem:[#allocation5 + $0x2c4] ss:$16 sps:$4 sm:$0xff]   ;;  %1252 = vmatprep.subr.bf16.mxu0 %v1726_v4  ;;  %v1731_v7 = vld [vmem:[#allocation5 + $0x2c0] ss:$16 sps:$4 sm:$0xff]   ;;  %s2074_s28 = scalar_lea.vmem %s1507_s2, 512  ;;  %p2079_p2 = scmp.lt.s32.totalorder %s1507_s2, %s1507_s2 }
  0x29   :  { %1293 = vmatprep.subr.bf16.mxu1 %v1728_v5  ;;  %v1732_v8 = vld [vmem:[#allocation5 + $0xa4] ss:$16 sps:$4 sm:$0xff]   ;;  %v1736_v10 = vld [vmem:[#allocation5 + $0xa0] ss:$16 sps:$4 sm:$0xff]   ;;  %1282 = vmatprep.mubr.bf16.mxu0 %v2135_v47  ;;  %v1825_v5 = vld [vmem:[#allocation5 + $0xec] ss:$16 sps:$4 sm:$0xff]   ;;  %p2075_p1 = scmp.ne.s32.totalorder %s1507_s2, %s2074_s28  ;;  %p2080_p3 = scmp.lt.s32.totalorder %s2074_s28, %s2074_s28 }
  0x2a   :  { %v1734_v9 = vld [vmem:[#allocation5 + $0x2a4] ss:$16 sps:$4 sm:$0xff]   ;;  %v1737_v11 = vld [vmem:[#allocation5 + $0x2a0] ss:$16 sps:$4 sm:$0xff]  }
  0x2b   :  { %1253 = vmatpush1.bf16.msra.mxu0 %v1730_v6  ;;  %v1738_v12 = vld [vmem:[#allocation5 + $0x84] ss:$16 sps:$4 sm:$0xff]   ;;  %v1742_v14 = vld [vmem:[#allocation5 + $0x80] ss:$16 sps:$4 sm:$0xff]   ;;  %v2141_v6 = vcombine.low %v52_v46, %v52_v46  ;;  %p2081_p4 = por %p2080_p3, %p2079_p2 }
  0x2c   :  { %1294 = vmatpush1.bf16.msra.mxu1 %v1731_v7  ;;  %1254 = vmatprep.subr.bf16.mxu0 %v1732_v8  ;;  %v1740_v13 = vld [vmem:[#allocation5 + $0x284] ss:$16 sps:$4 sm:$0xff]   ;;  %v1743_v15 = vld [vmem:[#allocation5 + $0x280] ss:$16 sps:$4 sm:$0xff]  }
  0x2d   :  { %1295 = vmatprep.subr.bf16.mxu1 %v1734_v9  ;;  %v1744_v16 = vld [vmem:[#allocation5 + $0x64] ss:$16 sps:$4 sm:$0xff]   ;;  %v1748_v18 = vld [vmem:[#allocation5 + $0x60] ss:$16 sps:$4 sm:$0xff]   ;;  %v1823_v9 = vld [vmem:[#allocation5 + $0xe8] ss:$16 sps:$4 sm:$0xff]   ;;  %p2082_p5 = pnand %p2081_p4, %p2075_p1 }
  0x2e   :  { %v1746_v17 = vld [vmem:[#allocation5 + $0x264] ss:$16 sps:$4 sm:$0xff]   ;;  %v1749_v19 = vld [vmem:[#allocation5 + $0x260] ss:$16 sps:$4 sm:$0xff]  }
  0x2f   :  { %1255 = vmatpush1.bf16.msra.mxu0 %v1736_v10  ;;  %v1750_v20 = vld [vmem:[#allocation5 + $0x44] ss:$16 sps:$4 sm:$0xff]   ;;  %v1754_v22 = vld [vmem:[#allocation5 + $0x40] ss:$16 sps:$4 sm:$0xff]  }
  0x30   :  { %1296 = vmatpush1.bf16.msra.mxu1 %v1737_v11  ;;  %1256 = vmatprep.subr.bf16.mxu0 %v1738_v12  ;;  %v1752_v21 = vld [vmem:[#allocation5 + $0x244] ss:$16 sps:$4 sm:$0xff]   ;;  %v1755_v23 = vld [vmem:[#allocation5 + $0x240] ss:$16 sps:$4 sm:$0xff]   ;;  %v1831_v11 = vld [vmem:[#allocation5 + $0xcc] ss:$16 sps:$4 sm:$0xff]  }
  0x31   :  { %1297 = vmatprep.subr.bf16.mxu1 %v1740_v13  ;;  %v1756_v24 = vld [vmem:[#allocation5 + $0x24] ss:$16 sps:$4 sm:$0xff]   ;;  %v1760_v26 = vld [vmem:[#allocation5 + $0x20] ss:$16 sps:$4 sm:$0xff]   ;;  %v1829_v13 = vld [vmem:[#allocation5 + $0xc8] ss:$16 sps:$4 sm:$0xff]  }
  0x32   :  { %v1758_v25 = vld [vmem:[#allocation5 + $0x224] ss:$16 sps:$4 sm:$0xff]   ;;  %v1761_v27 = vld [vmem:[#allocation5 + $0x220] ss:$16 sps:$4 sm:$0xff]  }
  0x33   :  { %1257 = vmatpush1.bf16.msra.mxu0 %v1742_v14  ;;  %v1762_v28 = vld [vmem:[#allocation5 + $0x4] ss:$16 sps:$4 sm:$0xff]   ;;  %v1766_v30 = vld [vmem:[#allocation5] ss:$16 sps:$4 sm:$0xff]  }
  0x34   :  { %1298 = vmatpush1.bf16.msra.mxu1 %v1743_v15  ;;  %1258 = vmatprep.subr.bf16.mxu0 %v1744_v16  ;;  %v1764_v29 = vld [vmem:[#allocation5 + $0x204] ss:$16 sps:$4 sm:$0xff]   ;;  %v1767_v31 = vld [vmem:[#allocation5 + $0x200] ss:$16 sps:$4 sm:$0xff]   ;;  %v1837_v15 = vld [vmem:[#allocation5 + $0xac] ss:$16 sps:$4 sm:$0xff]  }
  0x35   :  { %1299 = vmatprep.subr.bf16.mxu1 %v1746_v17  ;;  %v1768_v32 = vld [vmem:[#allocation5 + $0x1e4] ss:$16 sps:$4 sm:$0xff]   ;;  %v1772_v34 = vld [vmem:[#allocation5 + $0x1e0] ss:$16 sps:$4 sm:$0xff]   ;;  %v1835_v17 = vld [vmem:[#allocation5 + $0xa8] ss:$16 sps:$4 sm:$0xff]  }
  0x36   :  { %v1770_v33 = vld [vmem:[#allocation5 + $0x3e4] ss:$16 sps:$4 sm:$0xff]   ;;  %v1773_v35 = vld [vmem:[#allocation5 + $0x3e0] ss:$16 sps:$4 sm:$0xff]  }
  0x37   :  { %1259 = vmatpush1.bf16.msra.mxu0 %v1748_v18  ;;  %v1774_v36 = vld [vmem:[#allocation5 + $0x1c4] ss:$16 sps:$4 sm:$0xff]   ;;  %v1778_v38 = vld [vmem:[#allocation5 + $0x1c0] ss:$16 sps:$4 sm:$0xff]  }
  0x38   :  { %1300 = vmatpush1.bf16.msra.mxu1 %v1749_v19  ;;  %1260 = vmatprep.subr.bf16.mxu0 %v1750_v20  ;;  %v1776_v37 = vld [vmem:[#allocation5 + $0x3c4] ss:$16 sps:$4 sm:$0xff]   ;;  %v1779_v39 = vld [vmem:[#allocation5 + $0x3c0] ss:$16 sps:$4 sm:$0xff]   ;;  %v1843_v19 = vld [vmem:[#allocation5 + $0x8c] ss:$16 sps:$4 sm:$0xff]  }
  0x39   :  { %1301 = vmatprep.subr.bf16.mxu1 %v1752_v21  ;;  %v1780_v40 = vld [vmem:[#allocation5 + $0x1a4] ss:$16 sps:$4 sm:$0xff]   ;;  %v1784_v42 = vld [vmem:[#allocation5 + $0x1a0] ss:$16 sps:$4 sm:$0xff]   ;;  %v1841_v21 = vld [vmem:[#allocation5 + $0x88] ss:$16 sps:$4 sm:$0xff]  }
  0x3a   :  { %v1782_v41 = vld [vmem:[#allocation5 + $0x3a4] ss:$16 sps:$4 sm:$0xff]   ;;  %v1785_v43 = vld [vmem:[#allocation5 + $0x3a0] ss:$16 sps:$4 sm:$0xff]  }
  0x3b   :  { %1261 = vmatpush1.bf16.msra.mxu0 %v1754_v22  ;;  %v1786_v44 = vld [vmem:[#allocation5 + $0x184] ss:$16 sps:$4 sm:$0xff]   ;;  %v1790_v49 = vld [vmem:[#allocation5 + $0x180] ss:$16 sps:$4 sm:$0xff]  }
  0x3c   :  { %1302 = vmatpush1.bf16.msra.mxu1 %v1755_v23  ;;  %1262 = vmatprep.subr.bf16.mxu0 %v1756_v24  ;;  %v1788_v45 = vld [vmem:[#allocation5 + $0x384] ss:$16 sps:$4 sm:$0xff]   ;;  %v1791_v50 = vld [vmem:[#allocation5 + $0x380] ss:$16 sps:$4 sm:$0xff]   ;;  %v1849_v23 = vld [vmem:[#allocation5 + $0x6c] ss:$16 sps:$4 sm:$0xff]  }
  0x3d   :  { %1303 = vmatprep.subr.bf16.mxu1 %v1758_v25  ;;  %v53_v48 = vld [vmem:[#allocation2 + $0x8] sm:$0xff]  ;;  %v1847_v25 = vld [vmem:[#allocation5 + $0x68] ss:$16 sps:$4 sm:$0xff]  }
  0x3e   :  { %v2137_v51 = vcombine.high %v53_v48, %v53_v48  ;;  %v1792_v52 = vld [vmem:[#allocation5 + $0x164] ss:$16 sps:$4 sm:$0xff]   ;;  %v1796_v54 = vld [vmem:[#allocation5 + $0x160] ss:$16 sps:$4 sm:$0xff]   ;;  %v2143_v7 = vcombine.low %v53_v48, %v53_v48 }
  0x3f   :  { %1263 = vmatpush1.bf16.msra.mxu0 %v1760_v26  ;;  %v1794_v53 = vld [vmem:[#allocation5 + $0x364] ss:$16 sps:$4 sm:$0xff]   ;;  %v1797_v55 = vld [vmem:[#allocation5 + $0x360] ss:$16 sps:$4 sm:$0xff]  }
  0x40   :  { %1304 = vmatpush1.bf16.msra.mxu1 %v1761_v27  ;;  %1264 = vmatprep.subr.bf16.mxu0 %v1762_v28  ;;  %v1798_v56 = vld [vmem:[#allocation5 + $0x144] ss:$16 sps:$4 sm:$0xff]   ;;  %v1802_v58 = vld [vmem:[#allocation5 + $0x140] ss:$16 sps:$4 sm:$0xff]   ;;  %v1855_v27 = vld [vmem:[#allocation5 + $0x4c] ss:$16 sps:$4 sm:$0xff]  }
  0x41   :  { %1305 = vmatprep.subr.bf16.mxu1 %v1764_v29  ;;  %1323 = vmatprep.mubr.bf16.mxu1 %v2137_v51  ;;  %v1800_v57 = vld [vmem:[#allocation5 + $0x344] ss:$16 sps:$4 sm:$0xff]   ;;  %v1803_v59 = vld [vmem:[#allocation5 + $0x340] ss:$16 sps:$4 sm:$0xff]   ;;  %v1853_v29 = vld [vmem:[#allocation5 + $0x48] ss:$16 sps:$4 sm:$0xff]  }
  0x42   :  { %v1804_v60 = vld [vmem:[#allocation5 + $0x124] ss:$16 sps:$4 sm:$0xff]   ;;  %v1808_v62 = vld [vmem:[#allocation5 + $0x120] ss:$16 sps:$4 sm:$0xff]  }
  0x43   :  { %1265 = vmatpush1.bf16.msra.mxu0 %v1766_v30  ;;  %v1806_v61 = vld [vmem:[#allocation5 + $0x324] ss:$16 sps:$4 sm:$0xff]   ;;  %v1809_v63 = vld [vmem:[#allocation5 + $0x320] ss:$16 sps:$4 sm:$0xff]  }
  0x44   :  { %1306 = vmatpush1.bf16.msra.mxu1 %v1767_v31  ;;  %1266 = vmatprep.subr.bf16.mxu0 %v1768_v32  ;;  %v1810_v0 = vld [vmem:[#allocation5 + $0x104] ss:$16 sps:$4 sm:$0xff]   ;;  %v1814_v2 = vld [vmem:[#allocation5 + $0x100] ss:$16 sps:$4 sm:$0xff]   ;;  %v1861_v31 = vld [vmem:[#allocation5 + $0x2c] ss:$16 sps:$4 sm:$0xff]  }
  0x45   :  { %1307 = vmatprep.subr.bf16.mxu1 %v1770_v33  ;;  %v1812_v1 = vld [vmem:[#allocation5 + $0x304] ss:$16 sps:$4 sm:$0xff]   ;;  %v1815_v3 = vld [vmem:[#allocation5 + $0x300] ss:$16 sps:$4 sm:$0xff]   ;;  %v2148_v32 = vld [vmem:[#allocation2 + $0x10] sm:$0xff] }
  0x46   :  { %v1822_v4 = vld [vmem:[#allocation5 + $0x4e4] ss:$16 sps:$4 sm:$0xff]   ;;  %v1820_v8 = vld [vmem:[#allocation5 + $0x4e0] ss:$16 sps:$4 sm:$0xff]  }
  0x47   :  { %1267 = vmatpush2.bf16.msra.mxu0 %v1772_v34  ;;  %v1828_v10 = vld [vmem:[#allocation5 + $0x4c4] ss:$16 sps:$4 sm:$0xff]   ;;  %v1826_v12 = vld [vmem:[#allocation5 + $0x4c0] ss:$16 sps:$4 sm:$0xff]   ;;  %v2152_v34 = vcombine.high %v2148_v32, %v2148_v32 }
  0x48   :  { %1308 = vmatpush2.bf16.msra.mxu1 %v1773_v35  ;;  %1268 = vmatprep.subr.bf16.mxu0 %v1774_v36  ;;  %v1834_v14 = vld [vmem:[#allocation5 + $0x4a4] ss:$16 sps:$4 sm:$0xff]   ;;  %v1832_v16 = vld [vmem:[#allocation5 + $0x4a0] ss:$16 sps:$4 sm:$0xff]   ;;  %v1859_v35 = vld [vmem:[#allocation5 + $0x28] ss:$16 sps:$4 sm:$0xff]  }
  0x49   :  { %1309 = vmatprep.subr.bf16.mxu1 %v1776_v37  ;;  %v1840_v18 = vld [vmem:[#allocation5 + $0x484] ss:$16 sps:$4 sm:$0xff]   ;;  %v1838_v20 = vld [vmem:[#allocation5 + $0x480] ss:$16 sps:$4 sm:$0xff]   ;;  %v1867_v37 = vld [vmem:[#allocation5 + $0xc] ss:$16 sps:$4 sm:$0xff]  }
  0x4a   :  { %v1846_v22 = vld [vmem:[#allocation5 + $0x464] ss:$16 sps:$4 sm:$0xff]   ;;  %v1844_v24 = vld [vmem:[#allocation5 + $0x460] ss:$16 sps:$4 sm:$0xff]  }
  0x4b   :  { %1269 = vmatpush2.bf16.msra.mxu0 %v1778_v38  ;;  %v1852_v26 = vld [vmem:[#allocation5 + $0x444] ss:$16 sps:$4 sm:$0xff]   ;;  %v1850_v28 = vld [vmem:[#allocation5 + $0x440] ss:$16 sps:$4 sm:$0xff]  }
  0x4c   :  { %1310 = vmatpush2.bf16.msra.mxu1 %v1779_v39  ;;  %1270 = vmatprep.subr.bf16.mxu0 %v1780_v40  ;;  %v1858_v30 = vld [vmem:[#allocation5 + $0x424] ss:$16 sps:$4 sm:$0xff]   ;;  %v1856_v33 = vld [vmem:[#allocation5 + $0x420] ss:$16 sps:$4 sm:$0xff]   ;;  %v1865_v39 = vld [vmem:[#allocation5 + $0x8] ss:$16 sps:$4 sm:$0xff]  }
  0x4d   :  { %1311 = vmatprep.subr.bf16.mxu1 %v1782_v41  ;;  %v1864_v36 = vld [vmem:[#allocation5 + $0x404] ss:$16 sps:$4 sm:$0xff]   ;;  %v1862_v38 = vld [vmem:[#allocation5 + $0x400] ss:$16 sps:$4 sm:$0xff]   ;;  %v1873_v41 = vld [vmem:[#allocation5 + $0x1ec] ss:$16 sps:$4 sm:$0xff]  }
  0x4e   :  { %v1870_v40 = vld [vmem:[#allocation5 + $0x5e4] ss:$16 sps:$4 sm:$0xff]   ;;  %v1874_v46 = vld [vmem:[#allocation5 + $0x5c0] ss:$16 sps:$4 sm:$0xff]  }
  0x4f   :  { %1271 = vmatpush2.bf16.msra.mxu0 %v1784_v42  ;;  %v1868_v42 = vld [vmem:[#allocation5 + $0x5e0] ss:$16 sps:$4 sm:$0xff]   ;;  %v1882_v48 = vld [vmem:[#allocation5 + $0x5a4] ss:$16 sps:$4 sm:$0xff]  }
  0x50   :  { %1312 = vmatpush2.bf16.msra.mxu1 %v1785_v43  ;;  %1272 = vmatprep.subr.bf16.mxu0 %v1786_v44  ;;  %v1871_v43 = vld [vmem:[#allocation5 + $0x1e8] ss:$16 sps:$4 sm:$0xff]   ;;  %v1876_v44 = vld [vmem:[#allocation5 + $0x5c4] ss:$16 sps:$4 sm:$0xff]  }
  0x51   :  { %1313 = vmatprep.subr.bf16.mxu1 %v1788_v45  ;;  %v1879_v45 = vld [vmem:[#allocation5 + $0x1cc] ss:$16 sps:$4 sm:$0xff]  }
  0x53   :  { %1273 = vmatpush2.bf16.msra.mxu0 %v1790_v49  ;;  %v1885_v49 = vld [vmem:[#allocation5 + $0x1ac] ss:$16 sps:$4 sm:$0xff]  }
  0x54   :  { %1314 = vmatpush2.bf16.msra.mxu1 %v1791_v50  ;;  %1274 = vmatprep.subr.bf16.mxu0 %v1792_v52  ;;  %v1880_v50 = vld [vmem:[#allocation5 + $0x5a0] ss:$16 sps:$4 sm:$0xff]   ;;  %v1883_v52 = vld [vmem:[#allocation5 + $0x1a8] ss:$16 sps:$4 sm:$0xff]  }
  0x55   :  { %1315 = vmatprep.subr.bf16.mxu1 %v1794_v53  ;;  %v1888_v53 = vld [vmem:[#allocation5 + $0x584] ss:$16 sps:$4 sm:$0xff]  }
  0x57   :  { %1275 = vmatpush2.bf16.msra.mxu0 %v1796_v54  ;;  %v1891_v54 = vld [vmem:[#allocation5 + $0x18c] ss:$16 sps:$4 sm:$0xff]  }
  0x58   :  { %1316 = vmatpush2.bf16.msra.mxu1 %v1797_v55  ;;  %1276 = vmatprep.subr.bf16.mxu0 %v1798_v56  ;;  %v1886_v55 = vld [vmem:[#allocation5 + $0x580] ss:$16 sps:$4 sm:$0xff]   ;;  %v1889_v56 = vld [vmem:[#allocation5 + $0x188] ss:$16 sps:$4 sm:$0xff]  }
  0x59   :  { %1317 = vmatprep.subr.bf16.mxu1 %v1800_v57  ;;  %v1894_v57 = vld [vmem:[#allocation5 + $0x564] ss:$16 sps:$4 sm:$0xff]  }
  0x5b   :  { %1277 = vmatpush2.bf16.msra.mxu0 %v1802_v58  ;;  %v1897_v58 = vld [vmem:[#allocation5 + $0x16c] ss:$16 sps:$4 sm:$0xff]  }
  0x5c   :  { %1318 = vmatpush2.bf16.msra.mxu1 %v1803_v59  ;;  %1278 = vmatprep.subr.bf16.mxu0 %v1804_v60  ;;  %v1892_v59 = vld [vmem:[#allocation5 + $0x560] ss:$16 sps:$4 sm:$0xff]   ;;  %v1895_v60 = vld [vmem:[#allocation5 + $0x168] ss:$16 sps:$4 sm:$0xff]  }
  0x5d   :  { %1319 = vmatprep.subr.bf16.mxu1 %v1806_v61  ;;  %v1900_v61 = vld [vmem:[#allocation5 + $0x544] ss:$16 sps:$4 sm:$0xff]  }
  0x5f   :  { %1279 = vmatpush2.bf16.msra.mxu0 %v1808_v62  ;;  %v1903_v62 = vld [vmem:[#allocation5 + $0x14c] ss:$16 sps:$4 sm:$0xff]  }
  0x60   :  { %1320 = vmatpush2.bf16.msra.mxu1 %v1809_v63  ;;  %1280 = vmatprep.subr.bf16.mxu0 %v1810_v0  ;;  %v1898_v63 = vld [vmem:[#allocation5 + $0x540] ss:$16 sps:$4 sm:$0xff]   ;;  %v1901_v0 = vld [vmem:[#allocation5 + $0x148] ss:$16 sps:$4 sm:$0xff]  }
  0x61   :  { %1321 = vmatprep.subr.bf16.mxu1 %v1812_v1  ;;  %v1906_v1 = vld [vmem:[#allocation5 + $0x524] ss:$16 sps:$4 sm:$0xff]  }
  0x63   :  { %1281 = vmatpush2.bf16.msra.mxu0 %v1814_v2  ;;  %v1909_v2 = vld [vmem:[#allocation5 + $0x12c] ss:$16 sps:$4 sm:$0xff]  }
  0x64   :  { %1322 = vmatpush2.bf16.msra.mxu1 %v1815_v3  ;;  %1332 = vmatprep.subr.bf16.mxu0 %v1822_v4  ;;  %v1904_v3 = vld [vmem:[#allocation5 + $0x520] ss:$16 sps:$4 sm:$0xff]   ;;  %v1907_v4 = vld [vmem:[#allocation5 + $0x128] ss:$16 sps:$4 sm:$0xff]  }
  0x65   :  { %1373 = vmatprep.subr.bf16.mxu1 %v1825_v5  ;;  %v1912_v5 = vld [vmem:[#allocation5 + $0x504] ss:$16 sps:$4 sm:$0xff]  }
  0x66   :  { %1283 = vmatmul.mubr.bf16.vlgmr.msra.gmra.mxu0 %v2141_v6 }
  0x67   :  { %1324 = vmatmul.mubr.bf16.vlgmr.msra.gmra.mxu1 %v2143_v7  ;;  %1333 = vmatpush1.bf16.msra.mxu0 %v1820_v8  ;;  %v1915_v8 = vld [vmem:[#allocation5 + $0x10c] ss:$16 sps:$4 sm:$0xff]  }
  0x68   :  { %1374 = vmatpush1.bf16.msra.mxu1 %v1823_v9  ;;  %1334 = vmatprep.subr.bf16.mxu0 %v1828_v10  ;;  %v1910_v9 = vld [vmem:[#allocation5 + $0x500] ss:$16 sps:$4 sm:$0xff]   ;;  %v1913_v10 = vld [vmem:[#allocation5 + $0x108] ss:$16 sps:$4 sm:$0xff]  }
  0x69   :  { %1375 = vmatprep.subr.bf16.mxu1 %v1831_v11  ;;  %1405 = vmatprep.mubr.bf16.mxu1 %v2135_v47  ;;  %v1877_v47 = vld [vmem:[#allocation5 + $0x1c8] ss:$16 sps:$4 sm:$0xff]   ;;  %v1920_v11 = vld [vmem:[#allocation5 + $0x2ec] ss:$16 sps:$4 sm:$0xff]  }
  0x6a   :  { %1364 = vmatprep.mubr.bf16.mxu0 %v2152_v34 }
  0x6b   :  { %1335 = vmatpush1.bf16.msra.mxu0 %v1826_v12  ;;  %v1923_v12 = vld [vmem:[#allocation5 + $0x4ec] ss:$16 sps:$4 sm:$0xff]  }
  0x6c   :  { %1376 = vmatpush1.bf16.msra.mxu1 %v1829_v13  ;;  %1336 = vmatprep.subr.bf16.mxu0 %v1834_v14  ;;  %v2157_v13 = vcombine.low %v2148_v32, %v2148_v32  ;;  %v1918_v14 = vld [vmem:[#allocation5 + $0x2e8] ss:$16 sps:$4 sm:$0xff]  }
  0x6d   :  { %1377 = vmatprep.subr.bf16.mxu1 %v1837_v15  ;;  %v1921_v15 = vld [vmem:[#allocation5 + $0x4e8] ss:$16 sps:$4 sm:$0xff]  }
  0x6e   :  { %v1948_v32 = vld [vmem:[#allocation5 + $0x248] ss:$16 sps:$4 sm:$0xff]  }
  0x6f   :  { %1337 = vmatpush1.bf16.msra.mxu0 %v1832_v16  ;;  %v1926_v16 = vld [vmem:[#allocation5 + $0x2cc] ss:$16 sps:$4 sm:$0xff]  }
  0x70   :  { %1378 = vmatpush1.bf16.msra.mxu1 %v1835_v17  ;;  %1338 = vmatprep.subr.bf16.mxu0 %v1840_v18  ;;  %v1929_v17 = vld [vmem:[#allocation5 + $0x4cc] ss:$16 sps:$4 sm:$0xff]   ;;  %v1924_v18 = vld [vmem:[#allocation5 + $0x2c8] ss:$16 sps:$4 sm:$0xff]  }
  0x71   :  { %1379 = vmatprep.subr.bf16.mxu1 %v1843_v19  ;;  %v1927_v19 = vld [vmem:[#allocation5 + $0x4c8] ss:$16 sps:$4 sm:$0xff]  }
  0x73   :  { %1339 = vmatpush1.bf16.msra.mxu0 %v1838_v20  ;;  %v1932_v20 = vld [vmem:[#allocation5 + $0x2ac] ss:$16 sps:$4 sm:$0xff]  }
  0x74   :  { %1380 = vmatpush1.bf16.msra.mxu1 %v1841_v21  ;;  %1340 = vmatprep.subr.bf16.mxu0 %v1846_v22  ;;  %v1935_v21 = vld [vmem:[#allocation5 + $0x4ac] ss:$16 sps:$4 sm:$0xff]   ;;  %v1930_v22 = vld [vmem:[#allocation5 + $0x2a8] ss:$16 sps:$4 sm:$0xff]  }
  0x75   :  { %1381 = vmatprep.subr.bf16.mxu1 %v1849_v23  ;;  %v1933_v23 = vld [vmem:[#allocation5 + $0x4a8] ss:$16 sps:$4 sm:$0xff]  }
  0x77   :  { %1341 = vmatpush1.bf16.msra.mxu0 %v1844_v24  ;;  %v1938_v24 = vld [vmem:[#allocation5 + $0x28c] ss:$16 sps:$4 sm:$0xff]  }
  0x78   :  { %1382 = vmatpush1.bf16.msra.mxu1 %v1847_v25  ;;  %1342 = vmatprep.subr.bf16.mxu0 %v1852_v26  ;;  %v1936_v25 = vld [vmem:[#allocation5 + $0x288] ss:$16 sps:$4 sm:$0xff]  }
  0x79   :  { %1383 = vmatprep.subr.bf16.mxu1 %v1855_v27  ;;  %v1939_v26 = vld [vmem:[#allocation5 + $0x488] ss:$16 sps:$4 sm:$0xff]   ;;  %v1944_v27 = vld [vmem:[#allocation5 + $0x26c] ss:$16 sps:$4 sm:$0xff]  }
  0x7b   :  { %1343 = vmatpush1.bf16.msra.mxu0 %v1850_v28  ;;  %v1947_v28 = vld [vmem:[#allocation5 + $0x46c] ss:$16 sps:$4 sm:$0xff]  }
  0x7c   :  { %1384 = vmatpush1.bf16.msra.mxu1 %v1853_v29  ;;  %1344 = vmatprep.subr.bf16.mxu0 %v1858_v30  ;;  %v1945_v29 = vld [vmem:[#allocation5 + $0x468] ss:$16 sps:$4 sm:$0xff]   ;;  %v1950_v30 = vld [vmem:[#allocation5 + $0x24c] ss:$16 sps:$4 sm:$0xff]  }
  0x7d   :  { %1385 = vmatprep.subr.bf16.mxu1 %v1861_v31  ;;  %v1953_v31 = vld [vmem:[#allocation5 + $0x44c] ss:$16 sps:$4 sm:$0xff]  }
  0x7f   :  { %1345 = vmatpush1.bf16.msra.mxu0 %v1856_v33  ;;  %v1951_v33 = vld [vmem:[#allocation5 + $0x448] ss:$16 sps:$4 sm:$0xff]  }
  0x80   :  { %1386 = vmatpush1.bf16.msra.mxu1 %v1859_v35  ;;  %1346 = vmatprep.subr.bf16.mxu0 %v1864_v36  ;;  %v1959_v35 = vld [vmem:[#allocation5 + $0x42c] ss:$16 sps:$4 sm:$0xff]   ;;  %v1954_v36 = vld [vmem:[#allocation5 + $0x228] ss:$16 sps:$4 sm:$0xff]  }
  0x81   :  { %1387 = vmatprep.subr.bf16.mxu1 %v1867_v37  ;;  %v1957_v37 = vld [vmem:[#allocation5 + $0x428] ss:$16 sps:$4 sm:$0xff]  }
  0x83   :  { %1347 = vmatpush1.bf16.msra.mxu0 %v1862_v38  ;;  %v1962_v38 = vld [vmem:[#allocation5 + $0x20c] ss:$16 sps:$4 sm:$0xff]  }
  0x84   :  { %1388 = vmatpush1.bf16.msra.mxu1 %v1865_v39  ;;  %1348 = vmatprep.subr.bf16.mxu0 %v1870_v40  ;;  %v1965_v39 = vld [vmem:[#allocation5 + $0x40c] ss:$16 sps:$4 sm:$0xff]   ;;  %v1960_v40 = vld [vmem:[#allocation5 + $0x208] ss:$16 sps:$4 sm:$0xff]  }
  0x85   :  { %1389 = vmatprep.subr.bf16.mxu1 %v1873_v41  ;;  %v1963_v41 = vld [vmem:[#allocation5 + $0x408] ss:$16 sps:$4 sm:$0xff]  }
  0x87   :  { %1349 = vmatpush2.bf16.msra.mxu0 %v1868_v42  ;;  %v1968_v42 = vld [vmem:[#allocation5 + $0x3ec] ss:$16 sps:$4 sm:$0xff]  }
  0x88   :  { %1390 = vmatpush2.bf16.msra.mxu1 %v1871_v43  ;;  %1350 = vmatprep.subr.bf16.mxu0 %v1876_v44  ;;  %v1971_v43 = vld [vmem:[#allocation5 + $0x5ec] ss:$16 sps:$4 sm:$0xff]   ;;  %v1966_v44 = vld [vmem:[#allocation5 + $0x3e8] ss:$16 sps:$4 sm:$0xff]  }
  0x89   :  { %1391 = vmatprep.subr.bf16.mxu1 %v1879_v45  ;;  %v1969_v45 = vld [vmem:[#allocation5 + $0x5e8] ss:$16 sps:$4 sm:$0xff]  }
  0x8b   :  { %1351 = vmatpush2.bf16.msra.mxu0 %v1874_v46  ;;  %v1974_v46 = vld [vmem:[#allocation5 + $0x3cc] ss:$16 sps:$4 sm:$0xff]  }
  0x8c   :  { %1392 = vmatpush2.bf16.msra.mxu1 %v1877_v47  ;;  %1352 = vmatprep.subr.bf16.mxu0 %v1882_v48  ;;  %v1977_v47 = vld [vmem:[#allocation5 + $0x5cc] ss:$16 sps:$4 sm:$0xff]   ;;  %v1972_v48 = vld [vmem:[#allocation5 + $0x3c8] ss:$16 sps:$4 sm:$0xff]  }
  0x8d   :  { %1393 = vmatprep.subr.bf16.mxu1 %v1885_v49  ;;  %v1975_v49 = vld [vmem:[#allocation5 + $0x5c8] ss:$16 sps:$4 sm:$0xff]  }
  0x8f   :  { %1353 = vmatpush2.bf16.msra.mxu0 %v1880_v50  ;;  %v1980_v50 = vld [vmem:[#allocation5 + $0x3ac] ss:$16 sps:$4 sm:$0xff]  }
  0x90   :  { %1394 = vmatpush2.bf16.msra.mxu1 %v1883_v52  ;;  %1354 = vmatprep.subr.bf16.mxu0 %v1888_v53  ;;  %v1983_v52 = vld [vmem:[#allocation5 + $0x5ac] ss:$16 sps:$4 sm:$0xff]   ;;  %v1978_v53 = vld [vmem:[#allocation5 + $0x3a8] ss:$16 sps:$4 sm:$0xff]  }
  0x91   :  { %1395 = vmatprep.subr.bf16.mxu1 %v1891_v54  ;;  %v1981_v54 = vld [vmem:[#allocation5 + $0x5a8] ss:$16 sps:$4 sm:$0xff]  }
  0x93   :  { %1355 = vmatpush2.bf16.msra.mxu0 %v1886_v55  ;;  %v1986_v55 = vld [vmem:[#allocation5 + $0x38c] ss:$16 sps:$4 sm:$0xff]  }
  0x94   :  { %1396 = vmatpush2.bf16.msra.mxu1 %v1889_v56  ;;  %1356 = vmatprep.subr.bf16.mxu0 %v1894_v57  ;;  %v1989_v56 = vld [vmem:[#allocation5 + $0x58c] ss:$16 sps:$4 sm:$0xff]   ;;  %v1984_v57 = vld [vmem:[#allocation5 + $0x388] ss:$16 sps:$4 sm:$0xff]  }
  0x95   :  { %1397 = vmatprep.subr.bf16.mxu1 %v1897_v58  ;;  %v1987_v58 = vld [vmem:[#allocation5 + $0x588] ss:$16 sps:$4 sm:$0xff]  }
  0x97   :  { %1357 = vmatpush2.bf16.msra.mxu0 %v1892_v59  ;;  %v1992_v59 = vld [vmem:[#allocation5 + $0x36c] ss:$16 sps:$4 sm:$0xff]  }
  0x98   :  { %1398 = vmatpush2.bf16.msra.mxu1 %v1895_v60  ;;  %1358 = vmatprep.subr.bf16.mxu0 %v1900_v61  ;;  %v1995_v60 = vld [vmem:[#allocation5 + $0x56c] ss:$16 sps:$4 sm:$0xff]   ;;  %v1990_v61 = vld [vmem:[#allocation5 + $0x368] ss:$16 sps:$4 sm:$0xff]  }
  0x99   :  { %1399 = vmatprep.subr.bf16.mxu1 %v1903_v62  ;;  %v1993_v62 = vld [vmem:[#allocation5 + $0x568] ss:$16 sps:$4 sm:$0xff]  }
  0x9b   :  { %1359 = vmatpush2.bf16.msra.mxu0 %v1898_v63  ;;  %v1998_v63 = vld [vmem:[#allocation5 + $0x34c] ss:$16 sps:$4 sm:$0xff]  }
  0x9c   :  { %1400 = vmatpush2.bf16.msra.mxu1 %v1901_v0  ;;  %1360 = vmatprep.subr.bf16.mxu0 %v1906_v1  ;;  %v2001_v0 = vld [vmem:[#allocation5 + $0x54c] ss:$16 sps:$4 sm:$0xff]   ;;  %v1996_v1 = vld [vmem:[#allocation5 + $0x348] ss:$16 sps:$4 sm:$0xff]  }
  0x9d   :  { %1401 = vmatprep.subr.bf16.mxu1 %v1909_v2  ;;  %v1999_v2 = vld [vmem:[#allocation5 + $0x548] ss:$16 sps:$4 sm:$0xff]  }
  0x9f   :  { %1361 = vmatpush2.bf16.msra.mxu0 %v1904_v3  ;;  %v2004_v3 = vld [vmem:[#allocation5 + $0x32c] ss:$16 sps:$4 sm:$0xff]  }
  0xa0   :  { %1402 = vmatpush2.bf16.msra.mxu1 %v1907_v4  ;;  %1362 = vmatprep.subr.bf16.mxu0 %v1912_v5  ;;  %v2007_v4 = vld [vmem:[#allocation5 + $0x52c] ss:$16 sps:$4 sm:$0xff]   ;;  %v2002_v5 = vld [vmem:[#allocation5 + $0x328] ss:$16 sps:$4 sm:$0xff]  }
  0xa1   :  { %1403 = vmatprep.subr.bf16.mxu1 %v1915_v8  ;;  %v2005_v8 = vld [vmem:[#allocation5 + $0x528] ss:$16 sps:$4 sm:$0xff]  }
  0xa3   :  { %1363 = vmatpush2.bf16.msra.mxu0 %v1910_v9  ;;  %v2010_v9 = vld [vmem:[#allocation5 + $0x30c] ss:$16 sps:$4 sm:$0xff]  }
  0xa4   :  { %1404 = vmatpush2.bf16.msra.mxu1 %v1913_v10  ;;  %1414 = vmatprep.subr.bf16.mxu0 %v1920_v11  ;;  %v2013_v10 = vld [vmem:[#allocation5 + $0x50c] ss:$16 sps:$4 sm:$0xff]   ;;  %v2008_v11 = vld [vmem:[#allocation5 + $0x308] ss:$16 sps:$4 sm:$0xff]  }
  0xa5   :  { %1455 = vmatprep.subr.bf16.mxu1 %v1923_v12  ;;  %v2011_v12 = vld [vmem:[#allocation5 + $0x508] ss:$16 sps:$4 sm:$0xff]  }
  0xa6   :  { %1365 = vmatmul.mubr.bf16.vlgmr.msra.gmra.mxu0 %v2157_v13 }
  0xa7   :  { %1406 = vmatmul.mubr.bf16.vlgmr.msra.gmra.mxu1 %v2141_v6  ;;  %1415 = vmatpush1.bf16.msra.mxu0 %v1918_v14  ;;  %v1941_v6 = vld [vmem:[#allocation5 + $0x48c] ss:$16 sps:$4 sm:$0xff]  }
  0xa8   :  { %1456 = vmatpush1.bf16.msra.mxu1 %v1921_v15  ;;  %1416 = vmatprep.subr.bf16.mxu0 %v1926_v16 }
  0xa9   :  { %1457 = vmatprep.subr.bf16.mxu1 %v1929_v17  ;;  %1446 = vmatprep.mubr.bf16.mxu0 %v2137_v51  ;;  %v1942_v51 = vld [vmem:[#allocation5 + $0x268] ss:$16 sps:$4 sm:$0xff]  }
  0xaa   :  { %1487 = vmatprep.mubr.bf16.mxu1 %v2152_v34  ;;  %v1956_v34 = vld [vmem:[#allocation5 + $0x22c] ss:$16 sps:$4 sm:$0xff]  }
  0xab   :  { %1417 = vmatpush1.bf16.msra.mxu0 %v1924_v18 }
  0xac   :  { %1458 = vmatpush1.bf16.msra.mxu1 %v1927_v19  ;;  %1418 = vmatprep.subr.bf16.mxu0 %v1932_v20 }
  0xad   :  { %1459 = vmatprep.subr.bf16.mxu1 %v1935_v21 }
  0xaf   :  { %1419 = vmatpush1.bf16.msra.mxu0 %v1930_v22  ;;  %v249_v22 = vlaneseq }
  0xb0   :  { %1460 = vmatpush1.bf16.msra.mxu1 %v1933_v23  ;;  %1420 = vmatprep.subr.bf16.mxu0 %v1938_v24 }
  0xb1   :  { %1461 = vmatprep.subr.bf16.mxu1 %v1941_v6  ;;  %v250_v23 = vshrl.u32 %v249_v22, 7  ;;  %v247_v6 = vld [vmem:[#allocation7] sm:$0xf] }
  0xb3   :  { %1421 = vmatpush1.bf16.msra.mxu0 %v1936_v25  ;;  %v251_v24 = vsub.s32 0, %v250_v23  ;;  %v255_v25 = vsub.s32 1, %v250_v23 }
  0xb4   :  { %1462 = vmatpush1.bf16.msra.mxu1 %v1939_v26  ;;  %1422 = vmatprep.subr.bf16.mxu0 %v1944_v27 }
  0xb5   :  { %1463 = vmatprep.subr.bf16.mxu1 %v1947_v28  ;;  %v252_v26 = vrot.slane %v247_v6, %v251_v24  ;;  %v256_v27 = vrot.slane %v247_v6, %v255_v25 }
  0xb7   :  { %1423 = vmatpush1.bf16.msra.mxu0 %v1942_v51 }
  0xb8   :  { %1464 = vmatpush1.bf16.msra.mxu1 %v1945_v29  ;;  %1424 = vmatprep.subr.bf16.mxu0 %v1950_v30 }
  0xb9   :  { %1465 = vmatprep.subr.bf16.mxu1 %v1953_v31 }
  0xbb   :  { %1425 = vmatpush1.bf16.msra.mxu0 %v1948_v32 }
  0xbc   :  { %1466 = vmatpush1.bf16.msra.mxu1 %v1951_v33  ;;  %1426 = vmatprep.subr.bf16.mxu0 %v1956_v34 }
  0xbd   :  { %1467 = vmatprep.subr.bf16.mxu1 %v1959_v35 }
  0xbf   :  { %1427 = vmatpush1.bf16.msra.mxu0 %v1954_v36 }
  0xc0   :  { %1468 = vmatpush1.bf16.msra.mxu1 %v1957_v37  ;;  %1428 = vmatprep.subr.bf16.mxu0 %v1962_v38 }
  0xc1   :  { %1469 = vmatprep.subr.bf16.mxu1 %v1965_v39  ;;  %v259_v39 = vsub.s32 2, %v250_v23 }
  0xc3   :  { %1429 = vmatpush1.bf16.msra.mxu0 %v1960_v40  ;;  %v263_v40 = vsub.s32 3, %v250_v23 }
  0xc4   :  { %1470 = vmatpush1.bf16.msra.mxu1 %v1963_v41  ;;  %1430 = vmatprep.subr.bf16.mxu0 %v1968_v42  ;;  %v260_v41 = vrot.slane %v247_v6, %v259_v39 }
  0xc5   :  { %1471 = vmatprep.subr.bf16.mxu1 %v1971_v43  ;;  %v264_v42 = vrot.slane %v247_v6, %v263_v40 }
  0xc7   :  { %1431 = vmatpush2.bf16.msra.mxu0 %v1966_v44 }
  0xc8   :  { %1472 = vmatpush2.bf16.msra.mxu1 %v1969_v45  ;;  %1432 = vmatprep.subr.bf16.mxu0 %v1974_v46 }
  0xc9   :  { %1473 = vmatprep.subr.bf16.mxu1 %v1977_v47 }
  0xcb   :  { %1433 = vmatpush2.bf16.msra.mxu0 %v1972_v48 }
  0xcc   :  { %1474 = vmatpush2.bf16.msra.mxu1 %v1975_v49  ;;  %1434 = vmatprep.subr.bf16.mxu0 %v1980_v50 }
  0xcd   :  { %1475 = vmatprep.subr.bf16.mxu1 %v1983_v52 }
  0xcf   :  { %1435 = vmatpush2.bf16.msra.mxu0 %v1978_v53 }
  0xd0   :  { %1476 = vmatpush2.bf16.msra.mxu1 %v1981_v54  ;;  %1436 = vmatprep.subr.bf16.mxu0 %v1986_v55 }
  0xd1   :  { %1477 = vmatprep.subr.bf16.mxu1 %v1989_v56 }
  0xd3   :  { %1437 = vmatpush2.bf16.msra.mxu0 %v1984_v57 }
  0xd4   :  { %1478 = vmatpush2.bf16.msra.mxu1 %v1987_v58  ;;  %1438 = vmatprep.subr.bf16.mxu0 %v1992_v59 }
  0xd5   :  { %1479 = vmatprep.subr.bf16.mxu1 %v1995_v60 }
  0xd7   :  { %1439 = vmatpush2.bf16.msra.mxu0 %v1990_v61 }
  0xd8   :  { %1480 = vmatpush2.bf16.msra.mxu1 %v1993_v62  ;;  %1440 = vmatprep.subr.bf16.mxu0 %v1998_v63 }
  0xd9   :  { %1481 = vmatprep.subr.bf16.mxu1 %v2001_v0 }
  0xdb   :  { %1441 = vmatpush2.bf16.msra.mxu0 %v1996_v1 }
  0xdc   :  { %1482 = vmatpush2.bf16.msra.mxu1 %v1999_v2  ;;  %1442 = vmatprep.subr.bf16.mxu0 %v2004_v3 }
  0xdd   :  { %1483 = vmatprep.subr.bf16.mxu1 %v2007_v4 }
  0xdf   :  { %1443 = vmatpush2.bf16.msra.mxu0 %v2002_v5 }
  0xe0   :  { %1484 = vmatpush2.bf16.msra.mxu1 %v2005_v8  ;;  %1444 = vmatprep.subr.bf16.mxu0 %v2010_v9 }
  0xe1   :  { %1485 = vmatprep.subr.bf16.mxu1 %v2013_v10 }
  0xe3   :  { %1445 = vmatpush2.bf16.msra.mxu0 %v2008_v11 }
  0xe4   :  { %1486 = vmatpush2.bf16.msra.mxu1 %v2011_v12 }
  0xe6   :  { %1447 = vmatmul.mubr.bf16.vlgmr.msra.gmra.mxu0 %v2143_v7 }
  0xe7   :  { %1488 = vmatmul.mubr.bf16.vlgmr.msra.gmra.mxu1 %v2157_v13 }
 0x126   :  { %v1284_v14 = vpop.f32.mrf.mxu0 }
 0x127   :  { %v1325_v15 = vpop.f32.mrf.mxu1  ;;  %v1285_v28 = vadd.f32 %v1284_v14, %v252_v26 }
 0x128   :  { %v1286_v16 = vpop.f32.mrf.mxu0 }
 0x129   :  { %v1327_v17 = vpop.f32.mrf.mxu1  ;;  %v1287_v51 = vadd.f32 %v1286_v16, %v256_v27  ;;  %v1326_v7 = vadd.f32 %v1325_v15, %v1285_v28 }
 0x12a   :  { %v1288_v18 = vpop.f32.mrf.mxu0 }
 0x12b   :  { %v1329_v19 = vpop.f32.mrf.mxu1  ;;  %v1328_v30 = vadd.f32 %v1327_v17, %v1287_v51 }
 0x12c   :  { %v1289_v20 = vpop.f32.mrf.mxu0 }
 0x12d   :  { %v1330_v21 = vpop.f32.mrf.mxu1 }
 0x166   :  { %v1366_v29 = vpop.f32.mrf.mxu0 }
 0x167   :  { %v1407_v13 = vpop.f32.mrf.mxu1  ;;  %v1367_v31 = vadd.f32 %v1366_v29, %v1326_v7 }
 0x168   :  { %v1368_v32 = vpop.f32.mrf.mxu0  ;;  %v1408_v43 = vadd.f32 %v1407_v13, %v260_v41 }
 0x169   :  { %v1409_v33 = vpop.f32.mrf.mxu1  ;;  %1496 = vst [vmem:[#allocation8] sm:$0xff] %v1367_v31  ;;  %v1369_v34 = vadd.f32 %v1368_v32, %v1328_v30 }
 0x16a   :  { %v1370_v35 = vpop.f32.mrf.mxu0  ;;  %v1410_v46 = vadd.f32 %v1409_v33, %v264_v42 }
 0x16b   :  { %v1411_v36 = vpop.f32.mrf.mxu1  ;;  %1497 = vst [vmem:[#allocation8 + $0x8] sm:$0xff] %v1369_v34 }
 0x16c   :  { %v1371_v37 = vpop.f32.mrf.mxu0 }
 0x16d   :  { %v1412_v38 = vpop.f32.mrf.mxu1 }
 0x1a6   :  { %v1448_v44 = vpop.f32.mrf.mxu0 }
 0x1a7   :  { %v1489_v45 = vpop.f32.mrf.mxu1  ;;  %v1449_v47 = vadd.f32 %v1448_v44, %v1408_v43 }
 0x1a8   :  { %v1450_v48 = vpop.f32.mrf.mxu0 }
 0x1a9   :  { %v1491_v49 = vpop.f32.mrf.mxu1  ;;  %v1490_v50 = vadd.f32 %v1489_v45, %v1449_v47  ;;  %v1451_v52 = vadd.f32 %v1450_v48, %v1410_v46 }
 0x1aa   :  { %v1452_v53 = vpop.f32.mrf.mxu0 }
 0x1ab   :  { %v1493_v54 = vpop.f32.mrf.mxu1  ;;  %1498 = vst [vmem:[#allocation8 + $0x10] sm:$0xff] %v1490_v50  ;;  %v1492_v55 = vadd.f32 %v1491_v49, %v1451_v52 }
 0x1ac   :  { %v1453_v56 = vpop.f32.mrf.mxu0 }
 0x1ad   :  { %v1494_v57 = vpop.f32.mrf.mxu1  ;;  %1499 = vst [vmem:[#allocation8 + $0x18] sm:$0xff] %v1492_v55 }
 0x1ae   :  { %2085 = shalt.err (!%p2082_p5)
}
 0x1af   :  { %1509 = dma.vmem_to_hbm [thread:$0]  %s1507_s2, 512, %s2171_s3, [#allocation4]  }
 0x1b0   :  { %2098 = dma.done.wait [#allocation4], 512  }
 0x1b1   :  { %2099 = vsyncadd [#allocation4], 4294966784 }
 0x1b2   :  { %1513 = vsyncpa [#allocation3], 1 }
 0x1b3   :  { %1514 = vsyncpa [#allocation6], 1 }
 0x1b4   :  { %1515 = vsyncpa [#allocation4], 1 }

</bundles_post_ra>
